<compile_context>
chip_gen: v7x
topology: tpu7x:2x2x1
jax: 0.10.0
libtpu: 0.0.40
codegen_flags: <defaults>
</compile_context>

<pallas_src>
import jax
import jax.numpy as jnp
import numpy as np
from jax.experimental import pallas as pl
from jax.experimental.pallas import tpu as pltpu

NEG_SLOPE = 0.01  # F.leaky_relu default negative slope


# ----------------------------- kernel -------------------------------------- #

def _fused_ensemble_kernel(x_ref, w1_ref, b1_ref, w2_ref, b2_ref, a3_ref,
                           out_ref):
    """Fused forward for one micro-batch (one grid step).

    x_ref  : (1, B, E)  shared encoding for this micro-batch
    w1_ref : (E, NHp)   packed fc1 weights (member n in cols [n*H, (n+1)*H))
    b1_ref : (1, NHp)   packed fc1 bias (padding cols are 0)
    w2_ref : (NHp, Np)  block-diagonal fc2 weights (padding rows/cols are 0)
    b2_ref : (1, Np)    fc2 bias (padding cols are 0)
    a3_ref : (B, Np, B) routing tensor: final.weight routed through torch's
                        cat(dim=0).reshape(-1, N) interleave, with the final
                        bias folded into column n = N (see pack_params)
    out_ref: (1, 1, B)  final sigmoid output row for this micro-batch
    """
    x = x_ref[0]                                                     # (B, E)
    # fc1 of all ensemble members in one MXU pass: (B, E) @ (E, NHp).
    h = jnp.dot(x, w1_ref[...], preferred_element_type=jnp.float32) + b1_ref[...]
    h = jnp.maximum(h, NEG_SLOPE * h)                                # leaky_relu
    # fc2 of all members via block-diagonal weights: (B, NHp) @ (NHp, Np).
    logits = jnp.dot(h, w2_ref[...], preferred_element_type=jnp.float32) + b2_ref[...]
    p = jax.nn.sigmoid(logits)                                       # (B, Np)
    # Final mixing layer as ONE multiply + reduce on the VPU.  p[b, n] is net
    # n's prediction for sample b; padded column n = N is exactly 0.5 and
    # carries the folded final-layer bias.
    mix = jnp.sum(p[:, :, None] * a3_ref[...], axis=(0, 1), keepdims=True)  # (1,1,B)
    out_ref[...] = jax.nn.sigmoid(mix)


# ------------------------- wrapper-side packing ----------------------------- #

def _round_up(x, m):
    return ((x + m - 1) // m) * m


def pack_params(params, batch_size):
    """One-time packing of per-member weights into fused, lane-aligned operands
    (pure layout / param prep; no per-call compute)."""
    N, E, H = params["w1"].shape
    B = batch_size
    NH = N * H
    NHp = _round_up(NH, 128)      # lane-align the packed hidden dim (320 -> 384)
    Np = _round_up(N + 1, 8)      # pad member axis; >=1 spare column reserved
                                  # for the folded final bias (see a3 below)

    w1p = jnp.zeros((E, NHp), jnp.float32)
    w1p = w1p.at[:, :NH].set(
        jnp.transpose(params["w1"], (1, 0, 2)).reshape(E, NH))
    b1p = jnp.zeros((1, NHp), jnp.float32).at[0, :NH].set(
        params["b1"].reshape(NH))
    # TODO(synk): w1p (and x) could be stored as bf16 to halve the dominant
    # HBM->VMEM DMA; kept f32 here to preserve the tight numerical check.

    w2 = params["w2"][:, 0, :]                                       # (N, H)
    w2_blockdiag = (w2[:, :, None] *
                    jnp.eye(N, dtype=jnp.float32)[:, None, :]).reshape(NH, N)
    w2p = jnp.zeros((NHp, Np), jnp.float32).at[:NH, :N].set(w2_blockdiag)
    b2p = jnp.zeros((1, Np), jnp.float32).at[0, :N].set(params["b2"][:, 0, 0])

    # a3[b, n, r] = final.weight[c] where c = n*B + b - r*N is the column of
    # torch's total_pred.reshape(-1, N) that (net n, sample b) lands in for
    # output row r; zero when it lands in no column or n is padding.
    # TODO(synk): at large B this dense O(B^2 * Np) tensor is the first thing
    # to blow VMEM (v7x: 64 MiB physical); reformulate as in-kernel iota math /
    # gather-segment form before scaling the per-call batch.
    wf_flat = params["wf"][:, 0]                                     # (N,)
    b_idx = jnp.arange(B)[:, None, None]
    n_idx = jnp.arange(Np)[None, :, None]
    r_idx = jnp.arange(B)[None, None, :]
    c = n_idx * B + b_idx - r_idx * N
    valid = (c >= 0) & (c < N) & (n_idx < N)
    a3 = jnp.where(valid, wf_flat[jnp.clip(c, 0, N - 1)], 0.0).astype(jnp.float32)
    # Fold the final-layer bias into the contraction: the kernel's padded
    # column N of sigmoid(logits) is exactly sigmoid(0) = 0.5 (its fc2 weights
    # and bias are zero), so routing 2*bf through (b=0, n=N) adds bf to every
    # output row.
    a3 = a3.at[0, N, :].set(2.0 * params["bf"][0, 0])

    return {"w1p": w1p, "b1p": b1p, "w2p": w2p, "b2p": b2p, "a3": a3}


# ------------------------------ forward ------------------------------------- #

def ensemble_compnet_forward_batched(encodings, packed):
    """G independent forward passes of the module fused into one pallas_call.

    encodings: (G, B, E) -> (G, B, 1).  Each micro-batch g is one full forward
    pass of EnsembleCompNet; the cat/reshape mix couples samples *within* a
    micro-batch, so B must equal the batch_size used in pack_params.
    """
    G, B, E = encodings.shape
    NHp = packed["w1p"].shape[1]
    Np = packed["w2p"].shape[1]
    assert packed["a3"].shape == (B, Np, B), "pack_params batch_size mismatch"

    out = pl.pallas_call(
        _fused_ensemble_kernel,
        out_shape=jax.ShapeDtypeStruct((G, 1, B), jnp.float32),
        grid=(G,),
        in_specs=[
            # Per-step encoding block: pipelined (next block's DMA overlaps
            # current compute).
            pl.BlockSpec((1, B, E), lambda g: (g, 0, 0)),
            # Weights / routing: constant index_map -> DMA'd once, VMEM-resident
            # across all grid steps.
            pl.BlockSpec((E, NHp), lambda g: (0, 0)),
            pl.BlockSpec((1, NHp), lambda g: (0, 0)),
            pl.BlockSpec((NHp, Np), lambda g: (0, 0)),
            pl.BlockSpec((1, Np), lambda g: (0, 0)),
            pl.BlockSpec((B, Np, B), lambda g: (0, 0, 0)),
        ],
        out_specs=pl.BlockSpec((1, 1, B), lambda g: (g, 0, 0)),
        compiler_params=pltpu.CompilerParams(
            # Micro-batches are independent -> 'parallel' (sharded across the
            # two TensorCores on v7x).
            # TODO(synk): if a *single* micro-batch's B ever needs tiling, that
            # axis must be an 'arbitrary' reduction with a resident accumulator
            # (the final mix contracts over the whole batch), not 'parallel'.
            dimension_semantics=("parallel",)),
    )(encodings, packed["w1p"], packed["b1p"], packed["w2p"], packed["b2p"],
      packed["a3"])
    # (G, 1, B) -> (G, B, 1): pure metadata reshape, same element order.
    return out.reshape(G, B, 1)


def ensemble_compnet_forward(encoding, packed):
    """Module-faithful forward: encoding (B, E) -> (B, 1)."""
    return ensemble_compnet_forward_batched(encoding[None], packed)[0]


# ------------------------ deterministic params ------------------------------ #

def init_params(key, num_ensemble=5, encoding_dim=128, hidden=64):
    ks = jax.random.split(key, 6)

    def uniform(k, shape, fan_in):
        bound = 1.0 / np.sqrt(fan_in)
        return jax.random.uniform(k, shape, jnp.float32, -bound, bound)

    return {
        "w1": uniform(ks[0], (num_ensemble, encoding_dim, hidden), encoding_dim),
        "b1": uniform(ks[1], (num_ensemble, 1, hidden), encoding_dim),
        "w2": uniform(ks[2], (num_ensemble, 1, hidden), hidden),
        "b2": uniform(ks[3], (num_ensemble, 1, 1), hidden),
        "wf": uniform(ks[4], (num_ensemble, 1), num_ensemble),
        "bf": uniform(ks[5], (1, 1), num_ensemble),
    }


# ------------------------- pure-JAX reference ------------------------------- #

def reference_forward(encoding, params):
    """Faithful replica of the PyTorch forward (incl. the cat/reshape quirk),
    computed at HIGHEST matmul precision as the numerical ground truth."""
    N = params["w1"].shape[0]
    hp = jax.lax.Precision.HIGHEST
    preds = []
    for i in range(N):
        h = jnp.dot(encoding, params["w1"][i], precision=hp) + params["b1"][i]
        h = jnp.where(h >= 0.0, h, NEG_SLOPE * h)
        p = jax.nn.sigmoid(
            jnp.sum(h * params["w2"][i], axis=1, keepdims=True) + params["b2"][i])
        preds.append(p)
    total = jnp.concatenate(preds, axis=0).reshape(-1, N)
    return jax.nn.sigmoid(jnp.dot(total, params["wf"], precision=hp) + params["bf"])


# --------------------------------- main -------------------------------------- #

if __name__ == "__main__":
    B, E, N, H = 8, 128, 5, 64  # batch=8, encoding=128, 5-net ensemble, hidden=64
    G = 4                       # independent micro-batches fused into one call

    key = jax.random.PRNGKey(0)
    pkey, xkey = jax.random.split(key)
    params = init_params(pkey, num_ensemble=N, encoding_dim=E, hidden=H)
    encodings = jax.random.normal(xkey, (G, B, E), dtype=jnp.float32)

    packed = pack_params(params, batch_size=B)

    out_batched = jax.block_until_ready(
        ensemble_compnet_forward_batched(encodings, packed))
    out_single = jax.block_until_ready(
        ensemble_compnet_forward(encodings[0], packed))

    assert out_batched.shape == (G, B, 1)
    assert out_single.shape == (B, 1)

    # Tolerance covers possible bf16-pass MXU rounding of the kernel's f32
    # matmuls (default matmul precision); the reference runs at HIGHEST.
    refs = [reference_forward(encodings[g], params) for g in range(G)]
    for g in range(G):
        np.testing.assert_allclose(np.asarray(out_batched[g]), np.asarray(refs[g]),
                                   rtol=2e-3, atol=2e-3)
    np.testing.assert_allclose(np.asarray(out_single), np.asarray(refs[0]),
                               rtol=2e-3, atol=2e-3)
    print("KERNEL_OK")
</pallas_src>

<mosaic_0001>
module attributes {stable_mosaic.version = 11 : i64} {
  func.func @_fused_ensemble_kernel(%arg0: i32, %arg1: memref<1x8x128xf32, #tpu.memory_space<vmem>>, %arg2: memref<128x384xf32, #tpu.memory_space<vmem>>, %arg3: memref<1x384xf32, #tpu.memory_space<vmem>>, %arg4: memref<384x8xf32, #tpu.memory_space<vmem>>, %arg5: memref<1x8xf32, #tpu.memory_space<vmem>>, %arg6: memref<8x8x8xf32, #tpu.memory_space<vmem>>, %arg7: memref<1x1x8xf32, #tpu.memory_space<vmem>>) attributes {dimension_semantics = [#tpu.dimension_semantics<parallel>], iteration_bounds = array<i64: 4>, scalar_prefetch = 0 : i64, scratch_operands = 0 : i64, tpu.core_type = #tpu.core_type<tc>, window_params = [{transform_indices = @transform_0, window_bounds = array<i64: 1, 8, 128>}, {pipeline_mode = #tpu.pipeline_mode<synchronous>, transform_indices = @transform_1, window_bounds = array<i64: 128, 384>}, {pipeline_mode = #tpu.pipeline_mode<synchronous>, transform_indices = @transform_2, window_bounds = array<i64: 1, 384>}, {pipeline_mode = #tpu.pipeline_mode<synchronous>, transform_indices = @transform_3, window_bounds = array<i64: 384, 8>}, {pipeline_mode = #tpu.pipeline_mode<synchronous>, transform_indices = @transform_4, window_bounds = array<i64: 1, 8>}, {pipeline_mode = #tpu.pipeline_mode<synchronous>, transform_indices = @transform_5, window_bounds = array<i64: 8, 8, 8>}, {transform_indices = @transform_6, window_bounds = array<i64: 1, 1, 8>}]} {
    %c0 = arith.constant 0 : index
    %c0_0 = arith.constant 0 : index
    %c0_1 = arith.constant 0 : index
    %0 = vector.load %arg1[%c0, %c0_0, %c0_1] : memref<1x8x128xf32, #tpu.memory_space<vmem>>, vector<1x8x128xf32>
    %1 = vector.shape_cast %0 : vector<1x8x128xf32> to vector<8x128xf32>
    %c0_2 = arith.constant 0 : index
    %c0_3 = arith.constant 0 : index
    %2 = vector.load %arg2[%c0_2, %c0_3] : memref<128x384xf32, #tpu.memory_space<vmem>>, vector<128x384xf32>
    %cst = arith.constant dense<0.000000e+00> : vector<8x384xf32>
    %3 = tpu.matmul %1, %2, %cst {dimension_numbers = #tpu.dot_dimension_numbers<[1], [0], [0], [1], [0, 0, 1, 1], [], []>} : vector<8x128xf32>, vector<128x384xf32>, vector<8x384xf32> -> vector<8x384xf32>
    %c0_4 = arith.constant 0 : index
    %c0_5 = arith.constant 0 : index
    %4 = vector.load %arg3[%c0_4, %c0_5] : memref<1x384xf32, #tpu.memory_space<vmem>>, vector<1x384xf32>
    %5 = vector.broadcast %4 : vector<1x384xf32> to vector<8x384xf32>
    %6 = arith.addf %3, %5 : vector<8x384xf32>
    %cst_6 = arith.constant 0.00999999977 : f32
    %7 = vector.broadcast %cst_6 : f32 to vector<8x384xf32>
    %8 = arith.mulf %7, %6 : vector<8x384xf32>
    %9 = arith.maximumf %6, %8 : vector<8x384xf32>
    %c0_7 = arith.constant 0 : index
    %c0_8 = arith.constant 0 : index
    %10 = vector.load %arg4[%c0_7, %c0_8] : memref<384x8xf32, #tpu.memory_space<vmem>>, vector<384x8xf32>
    %cst_9 = arith.constant dense<0.000000e+00> : vector<8x8xf32>
    %11 = tpu.matmul %9, %10, %cst_9 {dimension_numbers = #tpu.dot_dimension_numbers<[1], [0], [0], [1], [0, 0, 1, 1], [], []>} : vector<8x384xf32>, vector<384x8xf32>, vector<8x8xf32> -> vector<8x8xf32>
    %c0_10 = arith.constant 0 : index
    %c0_11 = arith.constant 0 : index
    %12 = vector.load %arg5[%c0_10, %c0_11] : memref<1x8xf32, #tpu.memory_space<vmem>>, vector<1x8xf32>
    %13 = vector.broadcast %12 : vector<1x8xf32> to vector<8x8xf32>
    %14 = arith.addf %11, %13 : vector<8x8xf32>
    %15 = arith.negf %14 : vector<8x8xf32>
    %16 = math.exp %15 : vector<8x8xf32>
    %cst_12 = arith.constant 1.000000e+00 : f32
    %17 = vector.broadcast %cst_12 : f32 to vector<8x8xf32>
    %18 = arith.addf %17, %16 : vector<8x8xf32>
    %19 = arith.divf %17, %18 : vector<8x8xf32>
    %20 = vector.shape_cast %19 : vector<8x8xf32> to vector<8x8x1xf32>
    %c0_13 = arith.constant 0 : index
    %c0_14 = arith.constant 0 : index
    %c0_15 = arith.constant 0 : index
    %21 = vector.load %arg6[%c0_13, %c0_14, %c0_15] : memref<8x8x8xf32, #tpu.memory_space<vmem>>, vector<8x8x8xf32>
    %22 = vector.broadcast %20 : vector<8x8x1xf32> to vector<8x8x8xf32>
    %23 = arith.mulf %22, %21 : vector<8x8x8xf32>
    %cst_16 = arith.constant dense<0.000000e+00> : vector<8xf32>
    %24 = vector.multi_reduction <add>, %23, %cst_16 [0, 1] : vector<8x8x8xf32> to vector<8xf32>
    %25 = vector.shape_cast %24 : vector<8xf32> to vector<1x1x8xf32>
    %26 = arith.negf %25 : vector<1x1x8xf32>
    %27 = math.exp %26 : vector<1x1x8xf32>
    %cst_17 = arith.constant 1.000000e+00 : f32
    %28 = vector.broadcast %cst_17 : f32 to vector<1x1x8xf32>
    %29 = arith.addf %28, %27 : vector<1x1x8xf32>
    %30 = arith.divf %28, %29 : vector<1x1x8xf32>
    %c0_18 = arith.constant 0 : index
    %c0_19 = arith.constant 0 : index
    %c0_20 = arith.constant 0 : index
    %31 = vector.load %arg7[%c0_18, %c0_19, %c0_20] : memref<1x1x8xf32, #tpu.memory_space<vmem>>, vector<1x1x8xf32>
    tpu.vector_store %arg7[%c0_18, %c0_19, %c0_20], %30 {strides = array<i32>} : memref<1x1x8xf32, #tpu.memory_space<vmem>>, vector<1x1x8xf32>,
    return
  }
  func.func @transform_0(%arg0: i32) -> (i32, i32, i32) {
    %c0_i32 = arith.constant 0 : i32
    %c0_i32_0 = arith.constant 0 : i32
    %c0_i32_1 = arith.constant 0 : i32
    return %arg0, %c0_i32, %c0_i32_0 : i32, i32, i32
  }
  func.func @transform_1(%arg0: i32) -> (i32, i32) {
    %c0_i32 = arith.constant 0 : i32
    %c0_i32_0 = arith.constant 0 : i32
    %c0_i32_1 = arith.constant 0 : i32
    return %c0_i32, %c0_i32_0 : i32, i32
  }
  func.func @transform_2(%arg0: i32) -> (i32, i32) {
    %c0_i32 = arith.constant 0 : i32
    %c0_i32_0 = arith.constant 0 : i32
    %c0_i32_1 = arith.constant 0 : i32
    return %c0_i32, %c0_i32_0 : i32, i32
  }
  func.func @transform_3(%arg0: i32) -> (i32, i32) {
    %c0_i32 = arith.constant 0 : i32
    %c0_i32_0 = arith.constant 0 : i32
    %c0_i32_1 = arith.constant 0 : i32
    return %c0_i32, %c0_i32_0 : i32, i32
  }
  func.func @transform_4(%arg0: i32) -> (i32, i32) {
    %c0_i32 = arith.constant 0 : i32
    %c0_i32_0 = arith.constant 0 : i32
    %c0_i32_1 = arith.constant 0 : i32
    return %c0_i32, %c0_i32_0 : i32, i32
  }
  func.func @transform_5(%arg0: i32) -> (i32, i32, i32) {
    %c0_i32 = arith.constant 0 : i32
    %c0_i32_0 = arith.constant 0 : i32
    %c0_i32_1 = arith.constant 0 : i32
    %c0_i32_2 = arith.constant 0 : i32
    return %c0_i32, %c0_i32_0, %c0_i32_1 : i32, i32, i32
  }
  func.func @transform_6(%arg0: i32) -> (i32, i32, i32) {
    %c0_i32 = arith.constant 0 : i32
    %c0_i32_0 = arith.constant 0 : i32
    %c0_i32_1 = arith.constant 0 : i32
    return %arg0, %c0_i32, %c0_i32_0 : i32, i32, i32
  }
}

</mosaic_0001>

<bundles_post_ra>
// kernel: tpu_custom_call.1
= control target key start
LH: loop header
LB: loop body
LE: loop exit
PB: predicated region body
PF: predicated region fallthrough
CT: control target
= control target key end

     0   :  { %11 = vsyncpa [#allocation3], 0  ;;  %s1909_s0 = inlined_call_operand.hbm [shape: f32[4,8,128], index: 0, kind: input, shape index: {}]   ;;  %s1910_s1 = inlined_call_operand.vmem [shape: f32[128,384], index: 1, kind: input, shape index: {}]   ;;  %s1911_s2 = inlined_call_operand.vmem [shape: f32[1,384], index: 2, kind: input, shape index: {}]   ;;  %s1912_s3 = inlined_call_operand.vmem [shape: f32[384,8], index: 3, kind: input, shape index: {}]   ;;  %s1913_s4 = inlined_call_operand.vmem [shape: f32[1,8], index: 4, kind: input, shape index: {}]   ;;  %s1914_s5 = inlined_call_operand.hbm [shape: f32[8,8,8], index: 5, kind: input, shape index: {}]   ;;  %s1915_s6 = inlined_call_operand.hbm [shape: f32[4,1,8], index: 6, kind: output, shape index: {}]  }
   0x1   :  { %13 = vsyncpa [#allocation3 + $0x1], 0 }
   0x2   :  { %14 = vsyncpa [#allocation6], 0 }
   0x3   :  { %15 = vsyncpa [#allocation4], 0 }
   0x4   :  { %17 = vsyncpa [#allocation4 + $0x1], 0  ;;  %s1395_s21 = smov 0   ;;  %s1397_s22 = smov 0  }
   0x5   :  { %s1399_s23 = smov 0   ;;  %s1401_s24 = smov 0  }
   0x6 LB: > { %s1416_s25 = sadd.s32 4294967295, %s1350_s24   ;;  %s886_s26 = sadd.s32 4294967294, %s1350_s24   ;;  %s1350_s24 = sphi %s1401_s24, %s1934_s24   ;;  %s1346_s23 = sphi %s1399_s23, %s1933_s23   ;;  %s1342_s22 = sphi %s1397_s22, %s1932_s22   ;;  %s1338_s21 = sphi %s1395_s21, %s1931_s21  }
   0x7   : > { %p43_p0 = scmp.ne.s32.totalorder %s1342_s22, %s1338_s21  ;;  %p1916_p1 = scmp.eq.s32.totalorder %s1416_s25, 0 }
   0x8   : > { %p178_p3 = scmp.eq.s32.totalorder %s886_s26, 3  ;;  %p887_p5 = scmp.ge.s32.totalorder %s1350_s24, 1 }
   0x9   : > { %p1425_p4 = por %p1916_p1, %p43_p0  ;;  %p185_p7 = scmp.lt.s32.totalorder %s1350_s24, 5 }
   0xa   : > { %p1430_p6 = por %p178_p3, %p43_p0  ;;  %s1352_s30 = smov [#allocation5]  }
   0xb   : > { %s1919_s27 = scalar_select %p1425_p4, 1, 0 }
   0xc   : > { %s1920_s28 = scalar_select %p1430_p6, 1, 0 }
   0xd   : > { %p1435_p8 = pnand %p887_p5, %p185_p7  ;;  %s209_s7 = sshll.u32 %s1352_s30, 4  ;;  %s210_s7 = int_to_ptr.vmem [resolvable:$true] %s209_s7 }
   0xe   : > { %s1448_s9 = sadd.s32 1, %s1350_s24   ;;  %s30_s10 = sadd.s32 1, %s1346_s23 }
   0xf   : > { %s1921_s29 = scalar_select %p1435_p8, 1, 0 }
  0x10   : > { %p1160_p9 = pneg %p1435_p8  ;;  %s27_s11 = ssub.s32 %s1350_s24, %s1448_s9 }
  0x11   : > { %s1222_s14 = scalar_lea.hbm %s1914_s5, 1024 }
  0x12   : > { %p1443_p10 = pnand %p1160_p9, %p1916_p1  ;;  %p1223_p11 = scmp.ne.s32.totalorder %s1914_s5, %s1222_s14 }
  0x13   : > { %p1229_p3 = scmp.lt.u32.totalorder %s1222_s14, %s1914_s5 }
  0x14   : > { %p1224_p12 = pneg %p1443_p10 }
  0x16   : > { %p1225_p13 = pnand %p1224_p12, %p1223_p11 }
  0x18   : > { %p1226_p0 = pneg %p1225_p13 }
  0x1a   : > { %p1231_p5 = pnand %p1229_p3, %p1226_p0 }
  0x1c   : > { %1234 = shalt.err (!%p1231_p5)
}
  0x1d   : > { %s1235_s19 = scalar_lea.vmem %s210_s7, 1024  ;;  %p1243_p2 = scmp.lt.s32.totalorder %s210_s7, %s210_s7 }
  0x1e   : > { %p1236_p7 = scmp.ne.s32.totalorder %s210_s7, %s1235_s19  ;;  %p1244_p6 = scmp.lt.s32.totalorder %s1235_s19, %s1235_s19 }
  0x20   : > { %p1238_p9 = pnand %p1236_p7, %p1224_p12  ;;  %p1245_p4 = por %p1244_p6, %p1243_p2 }
  0x22   : > { %p1239_p1 = pneg %p1238_p9 }
  0x24   : > { %p1246_p8 = pnand %p1245_p4, %p1239_p1 }
  0x26   : > { %1249 = shalt.err (!%p1246_p8)
}
  0x27   : > { %s1353_s20 = smov 128   ;;  %s1354_s26 = smov 8  }
  0x28   : > { %1163 = dma.hbm_to_vmem [thread:$0]  (!%p1443_p10), %s1914_s5, 1024, %s210_s7, [#allocation6], %s1353_s20, %s1353_s20, %s1354_s26  }
  0x29   : > { %p28_p11 = scmp.eq.s32.totalorder %s27_s11, 0  ;;  %p37_p2 = scmp.ne.s32.totalorder %s1346_s23, %s1342_s22 }
  0x2a   : > { %p38_p1 = scmp.eq.s32.totalorder %s1350_s24, 0  ;;  %p1173_p4 = scmp.lt.s32.totalorder %s1350_s24, 4 }
  0x2b   : > { %s1474_s13 = scalar_select %p28_p11, %s1346_s23, %s30_s10  }
  0x2c   : > { %p39_p6 = por %p38_p1, %p37_p2  ;;  %p1923_p8 = scmp.eq.s32.totalorder %s1416_s25, 3 }
  0x2d   : > { %s223_s15 = sand.u32 1, %s1346_s23   ;;  %s891_s16 = sshll.u32 %s1350_s24, 7 }
  0x2e   : > { %p1478_p12 = por %p1923_p8, %p37_p2  ;;  %s890_s17 = sshll.u32 %s223_s15, 3 }
  0x2f   : > { %s1487_s19 = scalar_lea.hbm %s1909_s0, %s891_s16  ;;  %s227_s7 = scalar_lea.vmem [#allocation2], %s890_s17 }
  0x30   : > { %s234_s10 = sshll.u32 %s227_s7, 4  ;;  %p1489_p10 = pnand %p1173_p4, %p39_p6  ;;  %s1493_s10 = int_to_ptr.vmem [resolvable:$true] %s234_s10 }
  0x31   : > { %s224_s20 = scalar_lea.sflag [#allocation3], %s223_s15  ;;  %s1250_s26 = scalar_lea.hbm %s1487_s19, 128 }
  0x32   : > { %p1251_p13 = scmp.ne.s32.totalorder %s1487_s19, %s1250_s26  ;;  %p1252_p0 = pneg %p1489_p10 }
  0x33   : > { %s1255_s16 = scalar_lea.hbm %s1909_s0, 512  ;;  %p1256_p7 = scmp.lt.u32.totalorder %s1487_s19, %s1909_s0 }
  0x34   : > { %p1253_p3 = pnand %p1252_p0, %p1251_p13  ;;  %p1257_p9 = scmp.lt.u32.totalorder %s1255_s16, %s1250_s26 }
  0x35   : > { %p1259_p2 = scmp.lt.u32.totalorder %s1250_s26, %s1487_s19 }
  0x36   : > { %p1254_p5 = pneg %p1253_p3  ;;  %p1258_p11 = por %p1257_p9, %p1256_p7 }
  0x38   : > { %p1260_p1 = por %p1259_p2, %p1258_p11 }
  0x3a   : > { %p1261_p4 = pnand %p1260_p1, %p1254_p5 }
  0x3c   : > { %1264 = shalt.err (!%p1261_p4)
}
  0x3d   : > { %s1265_s15 = scalar_lea.vmem %s1493_s10, 128  ;;  %s1355_s18 = smov [#allocation2]  }
  0x3e   : > { %p1266_p6 = scmp.ne.s32.totalorder %s1493_s10, %s1265_s15  ;;  %s1270_s7 = sshll.u32 %s1355_s18, 4  ;;  %s1271_s7 = int_to_ptr.vmem [resolvable:$false] %s1270_s7 }
  0x3f   : > { %s1272_s30 = scalar_lea.vmem %s1271_s7, 256  ;;  %p1273_p3 = scmp.lt.s32.totalorder %s1493_s10, %s1271_s7 }
  0x40   : > { %p1268_p8 = pnand %p1266_p6, %p1252_p0  ;;  %p1274_p7 = scmp.lt.s32.totalorder %s1272_s30, %s1265_s15 }
  0x42   : > { %p1269_p13 = pneg %p1268_p8  ;;  %p1275_p9 = por %p1274_p7, %p1273_p3 }
  0x44   : > { %p1276_p11 = pnand %p1275_p9, %p1269_p13 }
  0x46   : > { %1279 = shalt.err (!%p1276_p11)
}
  0x47   : > { %1167 = dma.hbm_to_vmem [thread:$0]  (!%p1489_p10), %s1487_s19, 128, %s1493_s10, %s224_s20  }
  0x48   : > { %p1926_p5 = scmp.ne.s32.totalorder %s1921_s29, 0 }
  0x49   : > { %s1523_s26 = sand.u32 (!%p1926_p5), 1, %s1342_s22   ;;  %p1927_p0 = scmp.ne.s32.totalorder (!%p1926_p5), %s1919_s27, 0 }
  0x4a   : > { %243 = sbr.rel (%p1926_p5) target bundleno = 775 (0x307), region = 44  ;;  %s893_s12 = sshll.u32 (!%p1926_p5), %s1523_s26, 3 }
  0x4b   : > { %s246_s16 = scalar_lea.sflag (!%p1926_p5), [#allocation3], %s1523_s26  ;;  %s1527_s17 = scalar_lea.vmem (!%p1926_p5), [#allocation2], %s893_s12 }
  0x51   : > { %1325 = dma.done.wait (%p1927_p0), %s246_s16, 128  }
  0x52   : > { %1327 = vsyncadd (%p1927_p0), %s246_s16, 4294967168  ;;  %p1928_p10 = scmp.eq.s32.totalorder %s1416_s25, 0 }
  0x54   : > { %1329 = dma.done.wait (%p1928_p10), [#allocation6], 1024   ;;  %p1929_p2 = pmov %p1928_p10 }
  0x55   : > { %v1356_v0 = vmov 0.0|0.0   ;;  %v1357_v1 = vmov 0.0   ;;  %vm1358_vm0 = vmmov 0   ;;  %v283_v2 = vld [vmem:[%s1910_s1 + $0x8] sm:$0xff]  ;;  %v286_v3 = vld [vmem:[%s1910_s1 + $0x20] sm:$0xff]  ;;  %v285_v6 = vld [vmem:[%s1910_s1 + $0x18] sm:$0xff] }
  0x56   : > { %1331 = vsyncadd (%p1929_p2), [#allocation6], 4294966272  ;;  %1072 = vmatprep.subr.bf16.mxu1 %v1356_v0  ;;  %411 = vmatprep.mubr.f32.mxu0 %v1357_v1  ;;  %v282_v4 = vld [vmem:[%s1910_s1] sm:$0xff]  ;;  %v1040_v5 = vpack.c.bf16 %v286_v3, %v283_v2  ;;  %v289_v7 = vld [vmem:[%s1910_s1 + $0x38] sm:$0xff]  ;;  %vm767_vm1 = vcmask 64512   ;;  %s898_s18 = sshll.u32 %s1416_s25, 4 }
  0x57   : > { %1002 = vmatprep.mubr.msk.f32.mxu1 %vm1358_vm0, %v1357_v1  ;;  %v292_v8 = vld [vmem:[%s1910_s1 + $0x50] sm:$0xff]  ;;  %v1042_v9 = vpack.c.bf16 %v285_v6, %v282_v4  ;;  %v291_v12 = vld [vmem:[%s1910_s1 + $0x48] sm:$0xff]  ;;  %v298_v16 = vld [vmem:[%s1910_s1 + $0x80] sm:$0xff]  ;;  %s280_s7 = scalar_lea.vmem [#allocation7], %s1523_s26  ;;  %vm795_vm2 = vcmask 57344   ;;  %s1866_s29 = scalar_lea.hbm %s1915_s6, %s898_s18 }
  0x58   : > { %v1044_v10 = vpack.c.bf16 %v292_v8, %v289_v7  ;;  %v288_v11 = vld [vmem:[%s1910_s1 + $0x30] sm:$0xff]  ;;  %1041 = vmatprep.subr.bf16.mxu0 %v1040_v5  ;;  %v287_v14 = vld [vmem:[%s1910_s1 + $0x28] sm:$0xff]  ;;  %v290_v19 = vld [vmem:[%s1910_s1 + $0x40] sm:$0xff]  ;;  %s810_s30 = sshll.u32 %s280_s7, 4  ;;  %s798_s19 = scalar_lea.sflag [#allocation4], %s1523_s26  ;;  %s1868_s30 = int_to_ptr.vmem [resolvable:$true] %s810_s30 }
  0x59   : > { %v284_v13 = vld [vmem:[%s1910_s1 + $0x10] sm:$0xff]  ;;  %v295_v15 = vld [vmem:[%s1910_s1 + $0x68] sm:$0xff]  ;;  %1043 = vmatpush1.bf16.msra.mxu0 %v1042_v9  ;;  %v1046_v17 = vpack.c.bf16 %v291_v12, %v288_v11  ;;  %v294_v21 = vld [vmem:[%s1910_s1 + $0x60] sm:$0xff]  ;;  %s1280_s27 = scalar_lea.vmem %s1868_s30, 16  ;;  %s1359_s25 = smov [#allocation7]  }
  0x5a   : > { %v1073_v18 = vpack.c.bf16 %v287_v14, %v284_v13  ;;  %1045 = vmatprep.subr.bf16.mxu0 %v1044_v10  ;;  %v1048_v20 = vpack.c.bf16 %v298_v16, %v295_v15  ;;  %v297_v22 = vld [vmem:[%s1910_s1 + $0x78] sm:$0xff]  ;;  %v304_v26 = vld [vmem:[%s1910_s1 + $0xb0] sm:$0xff]  ;;  %v299_v28 = vld [vmem:[%s1910_s1 + $0x88] sm:$0xff]  ;;  %p1281_p1 = scmp.ne.s32.totalorder %s1868_s30, %s1280_s27 }
  0x5b   : > { %v293_v23 = vld [vmem:[%s1910_s1 + $0x58] sm:$0xff]  ;;  %v296_v27 = vld [vmem:[%s1910_s1 + $0x70] sm:$0xff]  ;;  %v1050_v29 = vpack.c.bf16 %v297_v22, %v294_v21  ;;  %v303_v32 = vld [vmem:[%s1910_s1 + $0xa8] sm:$0xff] }
  0x5c   : > { %1074 = vmatpush3.bf16.msra.mxu1 %v1073_v18  ;;  %v1076_v24 = vpack.c.bf16 %v293_v23, %v290_v19  ;;  %v301_v25 = vld [vmem:[%s1910_s1 + $0x98] sm:$0xff]  ;;  %v300_v31 = vld [vmem:[%s1910_s1 + $0x90] sm:$0xff]  ;;  %v1079_v33 = vpack.c.bf16 %v299_v28, %v296_v27  ;;  %v307_v34 = vld [vmem:[%s1910_s1 + $0xc8] sm:$0xff]  ;;  %p1282_p4 = pnand %p1281_p1, %p1478_p12 }
  0x5d   : > { %1075 = vmatprep.subr.bf16.mxu1 %v1356_v0  ;;  %1047 = vmatpush1.bf16.msra.mxu0 %v1046_v17  ;;  %v1052_v30 = vpack.c.bf16 %v304_v26, %v301_v25  ;;  %v310_v35 = vld [vmem:[%s1910_s1 + $0xe0] sm:$0xff]  ;;  %v305_v37 = vld [vmem:[%s1910_s1 + $0xb8] sm:$0xff]  ;;  %v1054_v38 = vpack.c.bf16 %v303_v32, %v300_v31  ;;  %v316_v44 = vld [vmem:[%s1910_s1 + $0x110] sm:$0xff] }
  0x5e   : > { %1049 = vmatprep.subr.bf16.mxu0 %v1048_v20  ;;  %v302_v36 = vld [vmem:[%s1910_s1 + $0xa0] sm:$0xff]  ;;  %v1056_v39 = vpack.c.bf16 %v310_v35, %v307_v34  ;;  %v309_v41 = vld [vmem:[%s1910_s1 + $0xd8] sm:$0xff]  ;;  %v308_v45 = vld [vmem:[%s1910_s1 + $0xd0] sm:$0xff]  ;;  %p1283_p6 = pneg %p1282_p4 }
  0x5f   : > { %v306_v40 = vld [vmem:[%s1910_s1 + $0xc0] sm:$0xff]  ;;  %v1082_v42 = vpack.c.bf16 %v305_v37, %v302_v36  ;;  %v313_v43 = vld [vmem:[%s1910_s1 + $0xf8] sm:$0xff]  ;;  %v311_v46 = vld [vmem:[%s1910_s1 + $0xe8] sm:$0xff] }
  0x60   : > { %1077 = vmatpush3.bf16.msra.mxu1 %v1076_v24  ;;  %v1058_v47 = vpack.c.bf16 %v309_v41, %v306_v40  ;;  %v1060_v48 = vpack.c.bf16 %v316_v44, %v313_v43  ;;  %v312_v49 = vld [vmem:[%s1910_s1 + $0xf0] sm:$0xff]  ;;  %v315_v50 = vld [vmem:[%s1910_s1 + $0x108] sm:$0xff]  ;;  %v1085_v51 = vpack.c.bf16 %v311_v46, %v308_v45  ;;  %v322_v53 = vld [vmem:[%s1910_s1 + $0x140] sm:$0xff] }
  0x61   : > { %1078 = vmatprep.subr.bf16.mxu1 %v1356_v0  ;;  %1051 = vmatpush1.bf16.msra.mxu0 %v1050_v29  ;;  %v319_v52 = vld [vmem:[%s1910_s1 + $0x128] sm:$0xff]  ;;  %v314_v54 = vld [vmem:[%s1910_s1 + $0x100] sm:$0xff]  ;;  %v317_v55 = vld [vmem:[%s1910_s1 + $0x118] sm:$0xff]  ;;  %v1062_v56 = vpack.c.bf16 %v315_v50, %v312_v49 }
  0x62   : > { %1053 = vmatprep.subr.bf16.mxu0 %v1052_v30  ;;  %v1064_v57 = vpack.c.bf16 %v322_v53, %v319_v52  ;;  %v318_v58 = vld [vmem:[%s1910_s1 + $0x120] sm:$0xff]  ;;  %v321_v59 = vld [vmem:[%s1910_s1 + $0x138] sm:$0xff]  ;;  %v1088_v60 = vpack.c.bf16 %v317_v55, %v314_v54  ;;  %v328_v62 = vld [vmem:[%s1910_s1 + $0x170] sm:$0xff] }
  0x63   : > { %v325_v61 = vld [vmem:[%s1910_s1 + $0x158] sm:$0xff]  ;;  %v320_v63 = vld [vmem:[%s1910_s1 + $0x130] sm:$0xff]  ;;  %v323_v2 = vld [vmem:[%s1910_s1 + $0x148] sm:$0xff]  ;;  %v1066_v3 = vpack.c.bf16 %v321_v59, %v318_v58 }
  0x64   : > { %1080 = vmatpush3.bf16.msra.mxu1 %v1079_v33  ;;  %v1068_v4 = vpack.c.bf16 %v328_v62, %v325_v61  ;;  %v324_v5 = vld [vmem:[%s1910_s1 + $0x150] sm:$0xff]  ;;  %v327_v6 = vld [vmem:[%s1910_s1 + $0x168] sm:$0xff]  ;;  %v1091_v7 = vpack.c.bf16 %v323_v2, %v320_v63  ;;  %v510_v8 = vld [vmem:[%s1912_s3 + $0x80] sm:$0xff] }
  0x65   : > { %1081 = vmatprep.subr.bf16.mxu1 %v1356_v0  ;;  %1055 = vmatpush1.bf16.msra.mxu0 %v1054_v38  ;;  %v511_v9 = vld [vmem:[%s1912_s3 + $0x88] sm:$0xff]  ;;  %v326_v10 = vld [vmem:[%s1910_s1 + $0x160] sm:$0xff]  ;;  %v329_v11 = vld [vmem:[%s1910_s1 + $0x178] sm:$0xff]  ;;  %v1070_v12 = vpack.c.bf16 %v327_v6, %v324_v5 }
  0x66   : > { %1057 = vmatprep.subr.bf16.mxu0 %v1056_v39  ;;  %v1096_v13 = vpack.c.bf16 %v511_v9, %v510_v8  ;;  %v494_v14 = vld [vmem:[%s1912_s3] sm:$0xff]  ;;  %v495_v15 = vld [vmem:[%s1912_s3 + $0x8] sm:$0xff]  ;;  %v1094_v16 = vpack.c.bf16 %v329_v11, %v326_v10  ;;  %v512_v17 = vld [vmem:[%s1912_s3 + $0x90] sm:$0xff] }
  0x67   : > { %v513_v18 = vld [vmem:[%s1912_s3 + $0x98] sm:$0xff]  ;;  %v526_v19 = vld [vmem:[%s1912_s3 + $0x100] sm:$0xff]  ;;  %v527_v20 = vld [vmem:[%s1912_s3 + $0x108] sm:$0xff]  ;;  %v1098_v22 = vpack.c.bf16 %v495_v15, %v494_v14 }
  0x68   : > { %1083 = vmatpush3.bf16.msra.mxu1 %v1082_v42  ;;  %v281_v21 = vld [vmem:[%s1527_s17] sm:$0xff]  ;;  %v1100_v23 = vpack.c.bf16 %v513_v18, %v512_v17  ;;  %v496_v24 = vld [vmem:[%s1912_s3 + $0x10] sm:$0xff]  ;;  %v497_v25 = vld [vmem:[%s1912_s3 + $0x18] sm:$0xff]  ;;  %v1129_v26 = vpack.c.bf16 %v527_v20, %v526_v19  ;;  %s1284_s17 = sshll.u32 %s1359_s25, 4  ;;  %s1285_s17 = int_to_ptr.vmem [resolvable:$false] %s1284_s17 }
  0x69   : > { %1084 = vmatprep.subr.bf16.mxu1 %v1356_v0  ;;  %1059 = vmatpush1.bf16.msra.mxu0 %v1058_v47  ;;  %v514_v27 = vld [vmem:[%s1912_s3 + $0xa0] sm:$0xff]  ;;  %v515_v28 = vld [vmem:[%s1912_s3 + $0xa8] sm:$0xff]  ;;  %v528_v29 = vld [vmem:[%s1912_s3 + $0x110] sm:$0xff]  ;;  %v1102_v31 = vpack.c.bf16 %v497_v25, %v496_v24  ;;  %s1286_s10 = scalar_lea.vmem %s1285_s17, 32  ;;  %p1287_p8 = scmp.lt.s32.totalorder %s1868_s30, %s1285_s17 }
  0x6a   : > { %1061 = vmatprep.subr.bf16.mxu0 %v1060_v48  ;;  %v529_v30 = vld [vmem:[%s1912_s3 + $0x118] sm:$0xff]  ;;  %v1104_v32 = vpack.c.bf16 %v515_v28, %v514_v27  ;;  %v498_v33 = vld [vmem:[%s1912_s3 + $0x20] sm:$0xff]  ;;  %v499_v34 = vld [vmem:[%s1912_s3 + $0x28] sm:$0xff]  ;;  %p1288_p13 = scmp.lt.s32.totalorder %s1286_s10, %s1280_s27 }
  0x6b   : > { %v1132_v35 = vpack.c.bf16 %v529_v30, %v528_v29  ;;  %v516_v36 = vld [vmem:[%s1912_s3 + $0xb0] sm:$0xff]  ;;  %v517_v37 = vld [vmem:[%s1912_s3 + $0xb8] sm:$0xff]  ;;  %v530_v38 = vld [vmem:[%s1912_s3 + $0x120] sm:$0xff]  ;;  %v1106_v40 = vpack.c.bf16 %v499_v34, %v498_v33 }
  0x6c   : > { %1086 = vmatpush3.bf16.msra.mxu1 %v1085_v51  ;;  %v531_v39 = vld [vmem:[%s1912_s3 + $0x128] sm:$0xff]  ;;  %v1108_v41 = vpack.c.bf16 %v517_v37, %v516_v36  ;;  %v500_v42 = vld [vmem:[%s1912_s3 + $0x30] sm:$0xff]  ;;  %v518_v44 = vld [vmem:[%s1912_s3 + $0xc0] sm:$0xff]  ;;  %p1289_p3 = por %p1288_p13, %p1287_p8 }
  0x6d   : > { %1087 = vmatprep.subr.bf16.mxu1 %v1356_v0  ;;  %1063 = vmatpush1.bf16.msra.mxu0 %v1062_v56  ;;  %v1135_v43 = vpack.c.bf16 %v531_v39, %v530_v38  ;;  %v519_v45 = vld [vmem:[%s1912_s3 + $0xc8] sm:$0xff]  ;;  %v532_v46 = vld [vmem:[%s1912_s3 + $0x130] sm:$0xff]  ;;  %v533_v47 = vld [vmem:[%s1912_s3 + $0x138] sm:$0xff] }
  0x6e   : > { %1065 = vmatprep.subr.bf16.mxu0 %v1064_v57  ;;  %v1112_v49 = vpack.c.bf16 %v519_v45, %v518_v44  ;;  %v502_v50 = vld [vmem:[%s1912_s3 + $0x40] sm:$0xff]  ;;  %v503_v51 = vld [vmem:[%s1912_s3 + $0x48] sm:$0xff]  ;;  %v1138_v52 = vpack.c.bf16 %v533_v47, %v532_v46  ;;  %v520_v53 = vld [vmem:[%s1912_s3 + $0xd0] sm:$0xff]  ;;  %p1290_p7 = pnand %p1289_p3, %p1283_p6 }
  0x6f   : > { %v521_v54 = vld [vmem:[%s1912_s3 + $0xd8] sm:$0xff]  ;;  %v534_v55 = vld [vmem:[%s1912_s3 + $0x140] sm:$0xff]  ;;  %v535_v56 = vld [vmem:[%s1912_s3 + $0x148] sm:$0xff]  ;;  %v1114_v57 = vpack.c.bf16 %v503_v51, %v502_v50 }
  0x70   : > { %1089 = vmatpush3.bf16.msra.mxu1 %v1088_v60  ;;  %v1116_v58 = vpack.c.bf16 %v521_v54, %v520_v53  ;;  %v504_v59 = vld [vmem:[%s1912_s3 + $0x50] sm:$0xff]  ;;  %v505_v60 = vld [vmem:[%s1912_s3 + $0x58] sm:$0xff]  ;;  %v1141_v61 = vpack.c.bf16 %v535_v56, %v534_v55  ;;  %v523_v5 = vld [vmem:[%s1912_s3 + $0xe8] sm:$0xff] }
  0x71   : > { %1090 = vmatprep.subr.bf16.mxu1 %v1356_v0  ;;  %1067 = vmatpush1.bf16.msra.mxu0 %v1066_v3  ;;  %v1118_v62 = vpack.c.bf16 %v505_v60, %v504_v59  ;;  %v536_v63 = vld [vmem:[%s1912_s3 + $0x150] sm:$0xff]  ;;  %v537_v2 = vld [vmem:[%s1912_s3 + $0x158] sm:$0xff]  ;;  %v507_v8 = vld [vmem:[%s1912_s3 + $0x68] sm:$0xff] }
  0x72   : > { %1069 = vmatprep.subr.bf16.mxu0 %v1068_v4  ;;  %v1144_v3 = vpack.c.bf16 %v537_v2, %v536_v63  ;;  %v522_v4 = vld [vmem:[%s1912_s3 + $0xe0] sm:$0xff]  ;;  %v539_v11 = vld [vmem:[%s1912_s3 + $0x168] sm:$0xff]  ;;  %v525_v14 = vld [vmem:[%s1912_s3 + $0xf8] sm:$0xff] }
  0x73   : > { %v1120_v6 = vpack.c.bf16 %v523_v5, %v522_v4  ;;  %v538_v10 = vld [vmem:[%s1912_s3 + $0x160] sm:$0xff]  ;;  %v509_v17 = vld [vmem:[%s1912_s3 + $0x78] sm:$0xff]  ;;  %v540_v19 = vld [vmem:[%s1912_s3 + $0x170] sm:$0xff] }
  0x74   : > { %1092 = vmatpush3.bf16.msra.mxu1 %v1091_v7  ;;  %v506_v7 = vld [vmem:[%s1912_s3 + $0x60] sm:$0xff]  ;;  %v541_v20 = vld [vmem:[%s1912_s3 + $0x178] sm:$0xff] }
  0x75   : > { %1093 = vmatprep.subr.bf16.mxu1 %v1356_v0  ;;  %1071 = vmatpush1.bf16.msra.mxu0 %v1070_v12  ;;  %v1122_v9 = vpack.c.bf16 %v507_v8, %v506_v7  ;;  %v1147_v12 = vpack.c.bf16 %v539_v11, %v538_v10  ;;  %v330_v25 = vld [vmem:[%s1911_s2] sm:$0x7]  ;;  %v754_v11 = vld [vmem:[#allocation5 + $0x18] sm:$0xff] }
  0x76   : > { %1097 = vmatprep.subr.bf16.mxu0 %v1096_v13  ;;  %v524_v13 = vld [vmem:[%s1912_s3 + $0xf0] sm:$0xff]  ;;  %v895_v45 = vld [vmem:[%s1913_s4] ss:$0 sm:$0xff] }
  0x77   : > { %v1124_v15 = vpack.c.bf16 %v525_v14, %v524_v13  ;;  %v753_v8 = vld [vmem:[#allocation5 + $0x10] sm:$0xff] }
  0x78   : > { %1095 = vmatpush3.bf16.msra.mxu1 %v1094_v16  ;;  %412 = vmatmul.mubr.f32.vlgmr.msra.gmra.mrb[0].mxu0 %v281_v21  ;;  %v508_v16 = vld [vmem:[%s1912_s3 + $0x70] sm:$0xff] }
  0x79   : > { %1128 = vmatprep.subr.bf16.mxu1 %v1356_v0  ;;  %1099 = vmatpush3.bf16.msra.mxu0 %v1098_v22  ;;  %v1126_v18 = vpack.c.bf16 %v509_v17, %v508_v16  ;;  %v332_v22 = vlaneseq  ;;  %v755_v16 = vld [vmem:[#allocation5 + $0x20] sm:$0xff] }
  0x7a   : > { %1101 = vmatprep.subr.bf16.mxu0 %v1100_v23 }
  0x7b   : > { %1003 = vmatmul.mubr.f32.vlgmr.msra.gmra.mrb[0].mxu1 %v281_v21  ;;  %v1150_v21 = vpack.c.bf16 %v541_v20, %v540_v19  ;;  %v333_v23 = vshrl.u32 %v332_v22, 7 }
  0x7c   : > { %1130 = vmatpush3.bf16.msra.mxu1 %v1129_v26  ;;  %1037 = vmatprep.mubr.msk.f32.mxu1 %vm1358_vm0, %v1357_v1  ;;  %v501_v1 = vld [vmem:[%s1912_s3 + $0x38] sm:$0xff] }
  0x7d   : > { %1131 = vmatprep.subr.bf16.mxu1 %v1356_v0  ;;  %1103 = vmatpush3.bf16.msra.mxu0 %v1102_v31  ;;  %v1110_v48 = vpack.c.bf16 %v501_v1, %v500_v42  ;;  %v334_v24 = vsub.s32 0, %v333_v23  ;;  %v338_v26 = vsub.s32 1, %v333_v23  ;;  %v718_v56 = vsub.s32 3, %v333_v23 }
  0x7e   : > { %1105 = vmatprep.subr.bf16.mxu0 %v1104_v32  ;;  %v732_v59 = vsub.s32 5, %v333_v23  ;;  %v725_v60 = vsub.s32 4, %v333_v23  ;;  %v746_v63 = vsub.s32 7, %v333_v23  ;;  %v739_v2 = vsub.s32 6, %v333_v23 }
  0x7f   : > { %v335_v27 = vrot.slane %v330_v25, %v334_v24  ;;  %v339_v28 = vrot.slane %v330_v25, %v338_v26 }
  0x80   : > { %1133 = vmatpush3.bf16.msra.mxu1 %v1132_v35 }
  0x81   : > { %1134 = vmatprep.subr.bf16.mxu1 %v1356_v0  ;;  %1107 = vmatpush3.bf16.msra.mxu0 %v1106_v40 }
  0x82   : > { %1109 = vmatprep.subr.bf16.mxu0 %v1108_v41 }
  0x84   : > { %1136 = vmatpush3.bf16.msra.mxu1 %v1135_v43 }
  0x85   : > { %1137 = vmatprep.subr.bf16.mxu1 %v1356_v0  ;;  %1111 = vmatpush3.bf16.msra.mxu0 %v1110_v48 }
  0x86   : > { %1113 = vmatprep.subr.bf16.mxu0 %v1112_v49 }
  0x88   : > { %1139 = vmatpush3.bf16.msra.mxu1 %v1138_v52 }
  0x89   : > { %1140 = vmatprep.subr.bf16.mxu1 %v1356_v0  ;;  %1115 = vmatpush3.bf16.msra.mxu0 %v1114_v57 }
  0x8a   : > { %1117 = vmatprep.subr.bf16.mxu0 %v1116_v58 }
  0x8c   : > { %1142 = vmatpush3.bf16.msra.mxu1 %v1141_v61 }
  0x8d   : > { %1143 = vmatprep.subr.bf16.mxu1 %v1356_v0  ;;  %1119 = vmatpush3.bf16.msra.mxu0 %v1118_v62 }
  0x8e   : > { %1121 = vmatprep.subr.bf16.mxu0 %v1120_v6  ;;  %v751_v6 = vld [vmem:[#allocation5] sm:$0xff] }
  0x90   : > { %1145 = vmatpush3.bf16.msra.mxu1 %v1144_v3 }
  0x91   : > { %1146 = vmatprep.subr.bf16.mxu1 %v1356_v0  ;;  %1123 = vmatpush3.bf16.msra.mxu0 %v1122_v9  ;;  %v752_v9 = vld [vmem:[#allocation5 + $0x8] sm:$0xff] }
  0x92   : > { %1125 = vmatprep.subr.bf16.mxu0 %v1124_v15 }
  0x94   : > { %1148 = vmatpush3.bf16.msra.mxu1 %v1147_v12 }
  0x95   : > { %1149 = vmatprep.subr.bf16.mxu1 %v1356_v0  ;;  %1127 = vmatpush3.bf16.msra.mxu0 %v1126_v18  ;;  %v342_v0 = vsub.s32 2, %v333_v23 }
  0x97   : > { %v343_v29 = vrot.slane %v330_v25, %v342_v0 }
  0x98   : > { %1151 = vmatpush3.bf16.msra.mxu1 %v1150_v21  ;;  %v756_v21 = vld [vmem:[#allocation5 + $0x28] sm:$0xff] }
 0x14b   : > { %v413_v30 = vpop.f32.mrb[0].mxu0 }
 0x14c   : > { %v414_v31 = vadd.f32 %v413_v30, %v335_v27  ;;  %v415_v32 = vpop.f32.mrb[1].mxu0  ;;  %v758_v30 = vld [vmem:[#allocation5 + $0x38] sm:$0xff] }
 0x14d   : > { %v416_v33 = vadd.f32 %v415_v32, %v339_v28 }
 0x14e   : > { %v484_v34 = vpop.f32.mrb[0].mxu1  ;;  %v488_v35 = vmul.f32 0.01, %v414_v31 }
 0x14f   : > { %v485_v36 = vadd.f32 %v484_v34, %v343_v29  ;;  %v1004_v37 = vpop.f32.mrb[1].mxu1  ;;  %v489_v38 = vmul.f32 0.01, %v416_v33 }
 0x150   : > { %v491_v41 = vmax.f32 %v414_v31, %v488_v35 }
 0x151   : > { %v490_v39 = vmul.f32 0.01, %v485_v36  ;;  %v492_v40 = vmax.f32 %v416_v33, %v489_v38 }
 0x153   : > { %v493_v42 = vmax.f32 %v485_v36, %v490_v39  ;;  %613 = vmatprep.mubr.f32.mxu0 %v492_v40 }
 0x154   : > { %614 = vmatmul.mubr.f32.vlgmr.msra.gmra.mrb[2].mxu0 %v491_v41 }
 0x155   : > { %1038 = vmatmul.mubr.f32.vlgmr.msra.gmra.mrb[2].mxu1 %v493_v42 }
 0x227   : > { %v950_v1 = vpop.f32.mrb[2].mxu0 }
 0x228   : > { %v685_v43 = vpop.f32.mrb[2].mxu1  ;;  %v951_v44 = vpop.f32.mrb[3].mxu0 }
 0x229   : > { %v1039_v46 = vpop.f32.mrb[3].mxu1  ;;  %v952_v47 = vadd.f32 %v951_v44, %v950_v1 }
 0x22b   : > { %v616_v48 = vadd.f32 %v952_v47, %v895_v45 }
 0x22d   : > { %v686_v49 = vadd.f32 %v685_v43, %v616_v48 }
 0x22f   : > { %v896_v50 = vmul.f32 -1.442695, %v686_v49 }
 0x231   : > { %1214 = vpow2.f32 %v896_v50 }
 0x23b   : > { %v1215_v51 = vpop.eup %1214 }
 0x23c   : > { %v692_v52 = vadd.f32 1.0, %v1215_v51 }
 0x23e   : > { %1216 = vrcp.f32 %v692_v52 }
 0x248   : > { %v1217_v53 = vpop.eup %1216 }
 0x249   : > { %v712_v54 = vrot.slane %v1217_v53, %v342_v0  ;;  %v698_v55 = vrot.slane %v1217_v53, %v334_v24  ;;  %v719_v57 = vrot.slane %v1217_v53, %v718_v56  ;;  %v705_v58 = vrot.slane %v1217_v53, %v338_v26  ;;  %v757_v0 = vld [vmem:[#allocation5 + $0x30] sm:$0xff] }
 0x24a   : > { %v733_v61 = vrot.slane %v1217_v53, %v732_v59  ;;  %v726_v62 = vrot.slane %v1217_v53, %v725_v60  ;;  %v747_v3 = vrot.slane %v1217_v53, %v746_v63  ;;  %v740_v4 = vrot.slane %v1217_v53, %v739_v2 }
 0x24b   : > { %714 = vbcast.lane.b32.xlu1 %v712_v54, 256  ;;  %700 = vbcast.lane.b32.xlu0 %v698_v55, 256 }
 0x24f   : > { %721 = vbcast.lane.b32.xlu1 %v719_v57, 256  ;;  %707 = vbcast.lane.b32.xlu0 %v705_v58, 256 }
 0x253   : > { %735 = vbcast.lane.b32.xlu1 %v733_v61, 256  ;;  %728 = vbcast.lane.b32.xlu0 %v726_v62, 256 }
 0x257   : > { %749 = vbcast.lane.b32.xlu1 %v747_v3, 256  ;;  %742 = vbcast.lane.b32.xlu0 %v740_v4, 256 }
 0x2bd   : > { %v715_v5 = vpop.permute.xlu1 %714  ;;  %v701_v7 = vpop.permute.xlu0 %700 }
 0x2be   : > { %v759_v10 = vmul.f32 %v751_v6, %v701_v7  ;;  %v761_v14 = vmul.f32 %v753_v8, %v715_v5 }
 0x2c0   : > { %v768_v17 = vsel %vm767_vm1, %v759_v10, 0.0  ;;  %v771_v24 = vsel %vm767_vm1, %v761_v14, 0.0 }
 0x2c1   : > { %v722_v12 = vpop.permute.xlu1 %721  ;;  %v708_v13 = vpop.permute.xlu0 %707 }
 0x2c2   : > { %v760_v15 = vmul.f32 %v752_v9, %v708_v13  ;;  %v762_v18 = vmul.f32 %v754_v11, %v722_v12 }
 0x2c4   : > { %v769_v19 = vsel %vm767_vm1, %v760_v15, 0.0  ;;  %v773_v27 = vsel %vm767_vm1, %v762_v18, 0.0 }
 0x2c5   : > { %v770_v20 = vadd.f32 %v769_v19, %v768_v17  ;;  %v736_v22 = vpop.permute.xlu1 %735  ;;  %v729_v23 = vpop.permute.xlu0 %728 }
 0x2c6   : > { %v763_v25 = vmul.f32 %v755_v16, %v729_v23  ;;  %v764_v28 = vmul.f32 %v756_v21, %v736_v22 }
 0x2c7   : > { %v772_v26 = vadd.f32 %v771_v24, %v770_v20 }
 0x2c8   : > { %v775_v33 = vsel %vm767_vm1, %v763_v25, 0.0  ;;  %v777_v36 = vsel %vm767_vm1, %v764_v28, 0.0 }
 0x2c9   : > { %v774_v29 = vadd.f32 %v773_v27, %v772_v26  ;;  %v750_v31 = vpop.permute.xlu1 %749  ;;  %v743_v32 = vpop.permute.xlu0 %742 }
 0x2ca   : > { %v765_v34 = vmul.f32 %v757_v0, %v743_v32  ;;  %v766_v37 = vmul.f32 %v758_v30, %v750_v31 }
 0x2cb   : > { %v776_v35 = vadd.f32 %v775_v33, %v774_v29 }
 0x2cc   : > { %v779_v39 = vsel %vm767_vm1, %v765_v34, 0.0  ;;  %v781_v41 = vsel %vm767_vm1, %v766_v37, 0.0 }
 0x2cd   : > { %v778_v38 = vadd.f32 %v777_v36, %v776_v35 }
 0x2cf   : > { %v780_v40 = vadd.f32 %v779_v39, %v778_v38 }
 0x2d1   : > { %v782_v42 = vadd.f32 %v781_v41, %v780_v40 }
 0x2d3   : > { %v783_v1 = vrot.slane %v782_v42, 4 }
 0x2d5   : > { %v784_v43 = vadd.f32 %v783_v1, %v782_v42 }
 0x2d7   : > { %v785_v44 = vrot.slane %v784_v43, 2 }
 0x2d9   : > { %v786_v45 = vadd.f32 %v785_v44, %v784_v43 }
 0x2db   : > { %v787_v46 = vrot.slane %v786_v45, 1 }
 0x2dd   : > { %v788_v47 = vadd.f32 %v787_v46, %v786_v45 }
 0x2df   : > { %v897_v48 = vmul.f32 -1.442695, %v788_v47 }
 0x2e1   : > { %1218 = vpow2.f32 %v897_v48 }
 0x2eb   : > { %v1219_v49 = vpop.eup %1218 }
 0x2ec   : > { %v792_v50 = vadd.f32 1.0, %v1219_v49 }
 0x2ee   : > { %1220 = vrcp.f32 %v792_v50 }
 0x2f8   : > { %v1221_v51 = vpop.eup %1220 }
 0x2f9   : > { %796 = vst.msk [vmem:[%s280_s7] sm:$0x1] %vm795_vm2, %v1221_v51 }
 0x2fa   : > { %1293 = shalt.err (!%p1290_p7)
}
 0x2fb   : > { %s1294_s26 = scalar_lea.hbm %s1866_s29, 16  ;;  %s1298_s8 = scalar_lea.hbm %s1915_s6, 64 }
 0x2fc   : > { %p1295_p9 = scmp.ne.s32.totalorder %s1866_s29, %s1294_s26  ;;  %p1299_p0 = scmp.lt.u32.totalorder %s1866_s29, %s1915_s6 }
 0x2fd   : > { %p1300_p10 = scmp.lt.u32.totalorder %s1298_s8, %s1294_s26  ;;  %p1302_p1 = scmp.lt.u32.totalorder %s1294_s26, %s1866_s29 }
 0x2fe   : > { %p1296_p11 = pnand %p1295_p9, %p1478_p12 }
 0x2ff   : > { %p1301_p2 = por %p1300_p10, %p1299_p0 }
 0x300   : > { %p1297_p5 = pneg %p1296_p11 }
 0x301   : > { %p1303_p4 = por %p1302_p1, %p1301_p2 }
 0x303   : > { %p1304_p6 = pnand %p1303_p4, %p1297_p5 }
 0x305   : > { %1307 = shalt.err (!%p1304_p6)
}
 0x306   : > { %1158 = dma.vmem_to_hbm [thread:$0]  (%p1478_p12), %s1868_s30, 16, %s1866_s29, %s798_s19  }
 0x307 PF: > { %p1175_p8 = scmp.ge.s32.totalorder %s1350_s24, 2  ;;  %s822_s7 = sand.u32 1, %s1338_s21  }
 0x308   : > { %p1930_p13 = scmp.ne.s32.totalorder %s1920_s28, 0  ;;  %s823_s12 = scalar_lea.sflag [#allocation4], %s822_s7 }
 0x30a   : > { %p1169_p3 = pnand %p1175_p8, %p1930_p13 }
 0x30c   : > { %1333 = dma.done.wait (!%p1169_p3), %s823_s12, 16  }
 0x30d   : > { %1335 = vsyncadd (!%p1169_p3), %s823_s12, 4294967280  ;;  %p20_p7 = scmp.ge.s32.totalorder %s1448_s9, 6   ;;  %s1931_s21 = smov %s1342_s22 }
 0x30e   : > { %s1932_s22 = smov %s1346_s23  ;;  %s1933_s23 = smov %s1474_s13 }
 0x30f   : > { %s1934_s24 = smov %s1448_s9  ;;  %22 = sbr.rel (!%p20_p7) target bundleno = 6 (0x6), region = 93 }
 0x316   :  { %827 = vsyncpa [#allocation3], 1 }
 0x317   :  { %829 = vsyncpa [#allocation3 + $0x1], 1 }
 0x318   :  { %830 = vsyncpa [#allocation6], 1 }
 0x319   :  { %831 = vsyncpa [#allocation4], 1 }
 0x31a   :  { %833 = vsyncpa [#allocation4 + $0x1], 1 }

</bundles_post_ra>
